<compile_context>
chip_gen: v7x
topology: tpu7x:2x2x1
jax: 0.10.0
libtpu: 0.0.40
codegen_flags: <defaults>
</compile_context>

<pallas_src>
import functools

import jax
import jax.numpy as jnp
from jax.experimental import pallas as pl
from jax.experimental.pallas import tpu as pltpu

BN_EPS = 1e-5


def _round_up(x, m):
    return (x + m - 1) // m * m


def conv_block_forward(x, weight, bias, gamma, beta, *, stride=1, padding=1):
    """ConvBlock forward: Conv2d(+bias) -> BatchNorm2d (training mode).

    x: (N, C_in, H, W) NCHW.  weight: (C_out, C_in, KH, KW) PyTorch OIHW.
    `bias` is accepted for signature parity but unused: the training-mode BN batch-mean
    subtraction cancels the conv bias exactly.
    """
    del bias  # mathematically cancelled by the BN mean subtraction
    N, C_in, H, W = x.shape
    C_out, _, KH, KW = weight.shape
    H_pad, W_pad = H + 2 * padding, W + 2 * padding
    OH1, OW1 = H_pad - KH + 1, W_pad - KW + 1              # stride-1 output extents
    OH = (H + 2 * padding - KH) // stride + 1
    OW = (W + 2 * padding - KW) // stride + 1

    C_IN_PAD = _round_up(max(C_in, 1), 16)   # full bf16 sublane tile per tap block
    n_taps = KH * KW
    K = n_taps * C_IN_PAD                    # MXU contraction dim (one dot, not 9)
    S_img = _round_up(H_pad * W_pad, 128)    # per-image flattened slab, 128-lane padded
    M = N * S_img                            # all images folded onto the lane axis
    off_max = (KH - 1) * W_pad + (KW - 1)
    GUARD = _round_up(max(off_max, 1), 128)  # guard so every tap slice stays in-bounds
    count = N * OH * OW                      # BN reduction count (valid strided outputs)
    inv_cnt = 1.0 / float(count)

    # ---- cheap JAX-side layout prep (input read once; no KH*KW HBM im2col) ----------
    xp = jnp.pad(x, ((0, 0), (0, 0), (padding, padding), (padding, padding)))
    x_img = xp.reshape(N, C_in, H_pad * W_pad)
    x_img = jnp.pad(x_img, ((0, 0), (0, C_IN_PAD - C_in), (0, S_img - H_pad * W_pad)))
    x_cat = x_img.transpose(1, 0, 2).reshape(C_IN_PAD, M)           # (C_in_pad, N*S_img)
    x_cat = jnp.pad(x_cat, ((0, 0), (0, GUARD))).astype(jnp.bfloat16)

    # weights lane-dense (C_out, K): column (kh*KW+kw)*C_IN_PAD + c = weight[:, c, kh, kw]
    w_flat = jnp.pad(weight.transpose(0, 2, 3, 1),
                     ((0, 0), (0, 0), (0, 0), (0, C_IN_PAD - C_in)))
    w_flat = w_flat.reshape(C_out, K).astype(jnp.bfloat16)

    # mask of slab columns that are valid (and stride-selected) conv outputs
    j = jnp.arange(S_img)
    i_row, j_col = j // W_pad, j % W_pad
    valid = (i_row < OH1) & (j_col < OW1)
    if stride > 1:
        valid = valid & (i_row % stride == 0) & (j_col % stride == 0)
    mask = jnp.tile(valid.astype(jnp.float32), (N,)).reshape(1, M)

    gamma2 = gamma.reshape(C_out, 1).astype(jnp.float32)
    beta2 = beta.reshape(C_out, 1).astype(jnp.float32)

    def kernel(x_ref, w_ref, mask_ref, gamma_ref, beta_ref, o_ref, slab_ref):
        xv = x_ref[...]                                    # (C_IN_PAD, M + GUARD) bf16
        # Build the K-concatenated im2col slab in VMEM.  Destination stores are bf16
        # tile-aligned (16-row blocks); the static lane-shifted source slices lower to
        # lane rotations feeding the copy (same bytes the per-tap relayouts cost before,
        # now done once and feeding a single matmul).
        for kh in range(KH):
            for kw in range(KW):
                t = kh * KW + kw
                off = kh * W_pad + kw
                slab_ref[t * C_IN_PAD:(t + 1) * C_IN_PAD, :] = xv[:, off:off + M]
        # One MXU matmul over the whole K = KH*KW*C_IN_PAD contraction dim, f32 accum.
        y = jnp.dot(w_ref[...], slab_ref[...],
                    preferred_element_type=jnp.float32)    # (C_out, M) f32, lane-dense
        m = mask_ref[...]                                  # (1, M) f32 validity mask
        # Training-mode BN over valid columns only; two-pass mean/var, all f32 on VPU.
        mean = jnp.sum(y * m, axis=1, keepdims=True) * inv_cnt        # (C_out, 1)
        cen = (y - mean) * m
        var = jnp.sum(cen * cen, axis=1, keepdims=True) * inv_cnt
        inv_std = jax.lax.rsqrt(var + BN_EPS)
        scale = gamma_ref[...] * inv_std
        shift = beta_ref[...] - mean * scale
        yn = y * scale + shift                             # (C_out, M) f32
        for b in range(N):                                 # aligned 128-multiple slices
            o_ref[b] = yn[:, b * S_img:(b + 1) * S_img]

    # TODO(synk): for large N*H*W (slab > ~16-24 MiB) fall back to a batch-tiled
    # two-pass variant (per-tile conv+stats, then normalize) and add a leading parallel
    # grid axis for v7x megacore; at these shapes a single resident invocation wins.
    y_slab = pl.pallas_call(
        kernel,
        out_shape=jax.ShapeDtypeStruct((N, C_out, S_img), jnp.float32),
        grid=(1,),
        in_specs=[
            pl.BlockSpec((C_IN_PAD, M + GUARD), lambda i: (0, 0)),
            pl.BlockSpec((C_out, K), lambda i: (0, 0)),
            pl.BlockSpec((1, M), lambda i: (0, 0)),
            pl.BlockSpec((C_out, 1), lambda i: (0, 0)),
            pl.BlockSpec((C_out, 1), lambda i: (0, 0)),
        ],
        out_specs=pl.BlockSpec((N, C_out, S_img), lambda i: (0, 0, 0)),
        scratch_shapes=[pltpu.VMEM((K, M), jnp.bfloat16)],
        compiler_params=pltpu.CompilerParams(
            dimension_semantics=("arbitrary",),
            vmem_limit_bytes=32 * 1024 * 1024,   # footprint here is <1 MiB; safe on v7x
        ),
        cost_estimate=pl.CostEstimate(
            flops=2 * C_out * K * M,
            transcendentals=C_out,
            bytes_accessed=(x_cat.size * 2 + w_flat.size * 2 + mask.size * 4
                            + N * C_out * S_img * 4),
        ),
    )(x_cat, w_flat, mask, gamma2, beta2)

    # (N, C_out, S_img) slab -> (N, C_out, OH1, W_pad) -> strided / valid crop -> NCHW.
    # OW is tiny here, so keep the lane-dense slab in-kernel and crop in the wrapper.
    y = y_slab[:, :, :OH1 * W_pad].reshape(N, C_out, OH1, W_pad)
    y = y[:, :, ::stride, ::stride][:, :, :OH, :OW]
    # TODO(synk): PyTorch BatchNorm2d in training mode also updates running_mean /
    # running_var buffers; this pure-functional forward does not emit them.
    return y


def _reference(x, weight, bias, gamma, beta, *, stride=1, padding=1):
    """Pure-JAX f32 reference matching PyTorch Conv2d + BatchNorm2d (training mode)."""
    y = jax.lax.conv_general_dilated(
        x, weight,
        window_strides=(stride, stride),
        padding=((padding, padding), (padding, padding)),
        dimension_numbers=("NCHW", "OIHW", "NCHW"),
    ) + bias.reshape(1, -1, 1, 1)
    mean = jnp.mean(y, axis=(0, 2, 3), keepdims=True)
    var = jnp.mean((y - mean) ** 2, axis=(0, 2, 3), keepdims=True)
    y_hat = (y - mean) * jax.lax.rsqrt(var + BN_EPS)
    return y_hat * gamma.reshape(1, -1, 1, 1) + beta.reshape(1, -1, 1, 1)


if __name__ == "__main__":
    # ConvBlock(in_channels=4, out_channels=8, kernel_size=3, stride=1, padding=1)
    N, C_in, H, W = 2, 4, 16, 16
    C_out, KH, KW = 8, 3, 3

    key = jax.random.PRNGKey(0)
    kx, kwt, kb, kg, kbe = jax.random.split(key, 5)
    x = jax.random.normal(kx, (N, C_in, H, W), dtype=jnp.float32)
    weight = jax.random.normal(kwt, (C_out, C_in, KH, KW), dtype=jnp.float32) * 0.1
    bias = jax.random.normal(kb, (C_out,), dtype=jnp.float32) * 0.1
    gamma = 1.0 + 0.1 * jax.random.normal(kg, (C_out,), dtype=jnp.float32)
    beta = 0.1 * jax.random.normal(kbe, (C_out,), dtype=jnp.float32)

    # stride=1 path (the default ConvBlock config)
    fwd = jax.jit(functools.partial(conv_block_forward, stride=1, padding=1))
    out = jax.block_until_ready(fwd(x, weight, bias, gamma, beta))
    ref = _reference(x, weight, bias, gamma, beta, stride=1, padding=1)
    assert out.shape == (N, C_out, H, W)
    # bf16 MXU operands vs a pure-f32 reference: tolerance sized for bf16 rounding.
    assert jnp.allclose(out, ref, atol=5e-2, rtol=5e-2), "stride=1 mismatch vs reference"

    # stride=2 path (exercises the strided BN mask and crop)
    fwd2 = jax.jit(functools.partial(conv_block_forward, stride=2, padding=1))
    out2 = jax.block_until_ready(fwd2(x, weight, bias, gamma, beta))
    ref2 = _reference(x, weight, bias, gamma, beta, stride=2, padding=1)
    assert out2.shape == ref2.shape
    assert jnp.allclose(out2, ref2, atol=5e-2, rtol=5e-2), "stride=2 mismatch vs reference"

    print("KERNEL_OK")
</pallas_src>

<mosaic_0001>
module attributes {stable_mosaic.version = 11 : i64} {
  func.func @kernel(%arg0: i32, %arg1: memref<16x896xbf16, #tpu.memory_space<vmem>>, %arg2: memref<8x144xbf16, #tpu.memory_space<vmem>>, %arg3: memref<1x768xf32, #tpu.memory_space<vmem>>, %arg4: memref<8x1xf32, #tpu.memory_space<vmem>>, %arg5: memref<8x1xf32, #tpu.memory_space<vmem>>, %arg6: memref<2x8x384xf32, #tpu.memory_space<vmem>>, %arg7: memref<144x768xbf16, #tpu.memory_space<vmem>>) attributes {dimension_semantics = [#tpu.dimension_semantics<arbitrary>], iteration_bounds = array<i64: 1>, scalar_prefetch = 0 : i64, scratch_operands = 1 : i64, tpu.core_type = #tpu.core_type<tc>, window_params = [{pipeline_mode = #tpu.pipeline_mode<synchronous>, transform_indices = @transform_0, window_bounds = array<i64: 16, 896>}, {pipeline_mode = #tpu.pipeline_mode<synchronous>, transform_indices = @transform_1, window_bounds = array<i64: 8, 144>}, {pipeline_mode = #tpu.pipeline_mode<synchronous>, transform_indices = @transform_2, window_bounds = array<i64: 1, 768>}, {pipeline_mode = #tpu.pipeline_mode<synchronous>, transform_indices = @transform_3, window_bounds = array<i64: 8, 1>}, {pipeline_mode = #tpu.pipeline_mode<synchronous>, transform_indices = @transform_4, window_bounds = array<i64: 8, 1>}, {pipeline_mode = #tpu.pipeline_mode<synchronous>, transform_indices = @transform_5, window_bounds = array<i64: 2, 8, 384>}]} {
    %c0 = arith.constant 0 : index
    %c0_0 = arith.constant 0 : index
    %0 = vector.load %arg1[%c0, %c0_0] : memref<16x896xbf16, #tpu.memory_space<vmem>>, vector<16x896xbf16>
    %1 = vector.extract_strided_slice %0 {offsets = [0, 0], sizes = [16, 768], strides = [1, 1]} : vector<16x896xbf16> to vector<16x768xbf16>
    %c0_1 = arith.constant 0 : index
    %c0_2 = arith.constant 0 : index
    %2 = vector.load %arg7[%c0_1, %c0_2] : memref<144x768xbf16, #tpu.memory_space<vmem>>, vector<16x768xbf16>
    tpu.vector_store %arg7[%c0_1, %c0_2], %1 {strides = array<i32>} : memref<144x768xbf16, #tpu.memory_space<vmem>>, vector<16x768xbf16>,
    %3 = vector.extract_strided_slice %0 {offsets = [0, 1], sizes = [16, 768], strides = [1, 1]} : vector<16x896xbf16> to vector<16x768xbf16>
    %c16 = arith.constant 16 : index
    %c0_3 = arith.constant 0 : index
    %4 = vector.load %arg7[%c16, %c0_3] : memref<144x768xbf16, #tpu.memory_space<vmem>>, vector<16x768xbf16>
    tpu.vector_store %arg7[%c16, %c0_3], %3 {strides = array<i32>} : memref<144x768xbf16, #tpu.memory_space<vmem>>, vector<16x768xbf16>,
    %5 = vector.extract_strided_slice %0 {offsets = [0, 2], sizes = [16, 768], strides = [1, 1]} : vector<16x896xbf16> to vector<16x768xbf16>
    %c32 = arith.constant 32 : index
    %c0_4 = arith.constant 0 : index
    %6 = vector.load %arg7[%c32, %c0_4] : memref<144x768xbf16, #tpu.memory_space<vmem>>, vector<16x768xbf16>
    tpu.vector_store %arg7[%c32, %c0_4], %5 {strides = array<i32>} : memref<144x768xbf16, #tpu.memory_space<vmem>>, vector<16x768xbf16>,
    %7 = vector.extract_strided_slice %0 {offsets = [0, 18], sizes = [16, 768], strides = [1, 1]} : vector<16x896xbf16> to vector<16x768xbf16>
    %c48 = arith.constant 48 : index
    %c0_5 = arith.constant 0 : index
    %8 = vector.load %arg7[%c48, %c0_5] : memref<144x768xbf16, #tpu.memory_space<vmem>>, vector<16x768xbf16>
    tpu.vector_store %arg7[%c48, %c0_5], %7 {strides = array<i32>} : memref<144x768xbf16, #tpu.memory_space<vmem>>, vector<16x768xbf16>,
    %9 = vector.extract_strided_slice %0 {offsets = [0, 19], sizes = [16, 768], strides = [1, 1]} : vector<16x896xbf16> to vector<16x768xbf16>
    %c64 = arith.constant 64 : index
    %c0_6 = arith.constant 0 : index
    %10 = vector.load %arg7[%c64, %c0_6] : memref<144x768xbf16, #tpu.memory_space<vmem>>, vector<16x768xbf16>
    tpu.vector_store %arg7[%c64, %c0_6], %9 {strides = array<i32>} : memref<144x768xbf16, #tpu.memory_space<vmem>>, vector<16x768xbf16>,
    %11 = vector.extract_strided_slice %0 {offsets = [0, 20], sizes = [16, 768], strides = [1, 1]} : vector<16x896xbf16> to vector<16x768xbf16>
    %c80 = arith.constant 80 : index
    %c0_7 = arith.constant 0 : index
    %12 = vector.load %arg7[%c80, %c0_7] : memref<144x768xbf16, #tpu.memory_space<vmem>>, vector<16x768xbf16>
    tpu.vector_store %arg7[%c80, %c0_7], %11 {strides = array<i32>} : memref<144x768xbf16, #tpu.memory_space<vmem>>, vector<16x768xbf16>,
    %13 = vector.extract_strided_slice %0 {offsets = [0, 36], sizes = [16, 768], strides = [1, 1]} : vector<16x896xbf16> to vector<16x768xbf16>
    %c96 = arith.constant 96 : index
    %c0_8 = arith.constant 0 : index
    %14 = vector.load %arg7[%c96, %c0_8] : memref<144x768xbf16, #tpu.memory_space<vmem>>, vector<16x768xbf16>
    tpu.vector_store %arg7[%c96, %c0_8], %13 {strides = array<i32>} : memref<144x768xbf16, #tpu.memory_space<vmem>>, vector<16x768xbf16>,
    %15 = vector.extract_strided_slice %0 {offsets = [0, 37], sizes = [16, 768], strides = [1, 1]} : vector<16x896xbf16> to vector<16x768xbf16>
    %c112 = arith.constant 112 : index
    %c0_9 = arith.constant 0 : index
    %16 = vector.load %arg7[%c112, %c0_9] : memref<144x768xbf16, #tpu.memory_space<vmem>>, vector<16x768xbf16>
    tpu.vector_store %arg7[%c112, %c0_9], %15 {strides = array<i32>} : memref<144x768xbf16, #tpu.memory_space<vmem>>, vector<16x768xbf16>,
    %17 = vector.extract_strided_slice %0 {offsets = [0, 38], sizes = [16, 768], strides = [1, 1]} : vector<16x896xbf16> to vector<16x768xbf16>
    %c128 = arith.constant 128 : index
    %c0_10 = arith.constant 0 : index
    %18 = vector.load %arg7[%c128, %c0_10] : memref<144x768xbf16, #tpu.memory_space<vmem>>, vector<16x768xbf16>
    tpu.vector_store %arg7[%c128, %c0_10], %17 {strides = array<i32>} : memref<144x768xbf16, #tpu.memory_space<vmem>>, vector<16x768xbf16>,
    %c0_11 = arith.constant 0 : index
    %c0_12 = arith.constant 0 : index
    %19 = vector.load %arg2[%c0_11, %c0_12] : memref<8x144xbf16, #tpu.memory_space<vmem>>, vector<8x144xbf16>
    %c0_13 = arith.constant 0 : index
    %c0_14 = arith.constant 0 : index
    %20 = vector.load %arg7[%c0_13, %c0_14] : memref<144x768xbf16, #tpu.memory_space<vmem>>, vector<144x768xbf16>
    %cst = arith.constant dense<0.000000e+00> : vector<8x768xf32>
    %21 = tpu.matmul %19, %20, %cst {dimension_numbers = #tpu.dot_dimension_numbers<[1], [0], [0], [1], [0, 0, 1, 1], [], []>} : vector<8x144xbf16>, vector<144x768xbf16>, vector<8x768xf32> -> vector<8x768xf32>
    %c0_15 = arith.constant 0 : index
    %c0_16 = arith.constant 0 : index
    %22 = vector.load %arg3[%c0_15, %c0_16] : memref<1x768xf32, #tpu.memory_space<vmem>>, vector<1x768xf32>
    %23 = vector.broadcast %22 : vector<1x768xf32> to vector<8x768xf32>
    %24 = arith.mulf %21, %23 : vector<8x768xf32>
    %cst_17 = arith.constant dense<0.000000e+00> : vector<8xf32>
    %25 = vector.multi_reduction <add>, %24, %cst_17 [1] : vector<8x768xf32> to vector<8xf32>
    %26 = vector.shape_cast %25 : vector<8xf32> to vector<8x1xf32>
    %cst_18 = arith.constant 0.001953125 : f32
    %27 = vector.broadcast %cst_18 : f32 to vector<8x1xf32>
    %28 = arith.mulf %26, %27 : vector<8x1xf32>
    %29 = vector.broadcast %28 : vector<8x1xf32> to vector<8x768xf32>
    %30 = arith.subf %21, %29 : vector<8x768xf32>
    %31 = vector.broadcast %22 : vector<1x768xf32> to vector<8x768xf32>
    %32 = arith.mulf %30, %31 : vector<8x768xf32>
    %33 = arith.mulf %32, %32 : vector<8x768xf32>
    %cst_19 = arith.constant dense<0.000000e+00> : vector<8xf32>
    %34 = vector.multi_reduction <add>, %33, %cst_19 [1] : vector<8x768xf32> to vector<8xf32>
    %35 = vector.shape_cast %34 : vector<8xf32> to vector<8x1xf32>
    %cst_20 = arith.constant 0.001953125 : f32
    %36 = vector.broadcast %cst_20 : f32 to vector<8x1xf32>
    %37 = arith.mulf %35, %36 : vector<8x1xf32>
    %cst_21 = arith.constant 9.99999974E-6 : f32
    %38 = vector.broadcast %cst_21 : f32 to vector<8x1xf32>
    %39 = arith.addf %37, %38 : vector<8x1xf32>
    %40 = math.rsqrt %39 : vector<8x1xf32>
    %c0_22 = arith.constant 0 : index
    %c0_23 = arith.constant 0 : index
    %41 = vector.load %arg4[%c0_22, %c0_23] : memref<8x1xf32, #tpu.memory_space<vmem>>, vector<8x1xf32>
    %42 = arith.mulf %41, %40 : vector<8x1xf32>
    %c0_24 = arith.constant 0 : index
    %c0_25 = arith.constant 0 : index
    %43 = vector.load %arg5[%c0_24, %c0_25] : memref<8x1xf32, #tpu.memory_space<vmem>>, vector<8x1xf32>
    %44 = arith.mulf %28, %42 : vector<8x1xf32>
    %45 = arith.subf %43, %44 : vector<8x1xf32>
    %46 = vector.broadcast %42 : vector<8x1xf32> to vector<8x768xf32>
    %47 = arith.mulf %21, %46 : vector<8x768xf32>
    %48 = vector.broadcast %45 : vector<8x1xf32> to vector<8x768xf32>
    %49 = arith.addf %47, %48 : vector<8x768xf32>
    %50 = vector.extract_strided_slice %49 {offsets = [0, 0], sizes = [8, 384], strides = [1, 1]} : vector<8x768xf32> to vector<8x384xf32>
    %c0_26 = arith.constant 0 : index
    %c0_27 = arith.constant 0 : index
    %c0_28 = arith.constant 0 : index
    %51 = vector.load %arg6[%c0_26, %c0_27, %c0_28] : memref<2x8x384xf32, #tpu.memory_space<vmem>>, vector<1x8x384xf32>
    %52 = vector.shape_cast %51 : vector<1x8x384xf32> to vector<8x384xf32>
    %53 = vector.shape_cast %50 : vector<8x384xf32> to vector<1x8x384xf32>
    tpu.vector_store %arg6[%c0_26, %c0_27, %c0_28], %53 {strides = array<i32>} : memref<2x8x384xf32, #tpu.memory_space<vmem>>, vector<1x8x384xf32>,
    %54 = vector.extract_strided_slice %49 {offsets = [0, 384], sizes = [8, 384], strides = [1, 1]} : vector<8x768xf32> to vector<8x384xf32>
    %c1 = arith.constant 1 : index
    %c0_29 = arith.constant 0 : index
    %c0_30 = arith.constant 0 : index
    %55 = vector.load %arg6[%c1, %c0_29, %c0_30] : memref<2x8x384xf32, #tpu.memory_space<vmem>>, vector<1x8x384xf32>
    %56 = vector.shape_cast %55 : vector<1x8x384xf32> to vector<8x384xf32>
    %57 = vector.shape_cast %54 : vector<8x384xf32> to vector<1x8x384xf32>
    tpu.vector_store %arg6[%c1, %c0_29, %c0_30], %57 {strides = array<i32>} : memref<2x8x384xf32, #tpu.memory_space<vmem>>, vector<1x8x384xf32>,
    return
  }
  func.func @transform_0(%arg0: i32) -> (i32, i32) {
    %c0_i32 = arith.constant 0 : i32
    %c0_i32_0 = arith.constant 0 : i32
    %c0_i32_1 = arith.constant 0 : i32
    return %c0_i32, %c0_i32_0 : i32, i32
  }
  func.func @transform_1(%arg0: i32) -> (i32, i32) {
    %c0_i32 = arith.constant 0 : i32
    %c0_i32_0 = arith.constant 0 : i32
    %c0_i32_1 = arith.constant 0 : i32
    return %c0_i32, %c0_i32_0 : i32, i32
  }
  func.func @transform_2(%arg0: i32) -> (i32, i32) {
    %c0_i32 = arith.constant 0 : i32
    %c0_i32_0 = arith.constant 0 : i32
    %c0_i32_1 = arith.constant 0 : i32
    return %c0_i32, %c0_i32_0 : i32, i32
  }
  func.func @transform_3(%arg0: i32) -> (i32, i32) {
    %c0_i32 = arith.constant 0 : i32
    %c0_i32_0 = arith.constant 0 : i32
    %c0_i32_1 = arith.constant 0 : i32
    return %c0_i32, %c0_i32_0 : i32, i32
  }
  func.func @transform_4(%arg0: i32) -> (i32, i32) {
    %c0_i32 = arith.constant 0 : i32
    %c0_i32_0 = arith.constant 0 : i32
    %c0_i32_1 = arith.constant 0 : i32
    return %c0_i32, %c0_i32_0 : i32, i32
  }
  func.func @transform_5(%arg0: i32) -> (i32, i32, i32) {
    %c0_i32 = arith.constant 0 : i32
    %c0_i32_0 = arith.constant 0 : i32
    %c0_i32_1 = arith.constant 0 : i32
    %c0_i32_2 = arith.constant 0 : i32
    return %c0_i32, %c0_i32_0, %c0_i32_1 : i32, i32, i32
  }
}

</mosaic_0001>

<bundles_post_ra>
// kernel: conv_block_forward.1
= control target key start
LH: loop header
LB: loop body
LE: loop exit
PB: predicated region body
PF: predicated region fallthrough
CT: control target
= control target key end

     0   :  { %s674_s22 = smov 127   ;;  %s675_s27 = smov 126   ;;  %vm395_vm0 = vcmask 130048   ;;  %vm84_vm1 = vcmask 1039360   ;;  %vm117_vm2 = vcmask 1031168   ;;  %vm150_vm3 = vcmask 900096   ;;  %s972_s0 = inlined_call_operand.vmem [shape: bf16[16,896], index: 0, kind: input, shape index: {}]   ;;  %s973_s1 = inlined_call_operand.vmem [shape: bf16[8,144], index: 1, kind: input, shape index: {}]   ;;  %s974_s2 = inlined_call_operand.vmem [shape: f32[1,768], index: 2, kind: input, shape index: {}]   ;;  %s975_s3 = inlined_call_operand.vmem [shape: f32[8,1], index: 3, kind: input, shape index: {}]   ;;  %s976_s4 = inlined_call_operand.vmem [shape: f32[8,1], index: 4, kind: input, shape index: {}]   ;;  %s977_s5 = inlined_call_operand.vmem [shape: f32[2,8,384], index: 5, kind: output, shape index: {}]  }
   0x1   :  { %v660_v0 = vld [vmem:[%s972_s0 + $0x4] ss:$28 sps:$4 sm:$0xff]   ;;  %v726_v3 = vld [vmem:[%s972_s0 + $0xc] ss:$28 sps:$4 sm:$0xff]   ;;  %s676_s28 = smov 110   ;;  %s677_s29 = smov 109  }
   0x2   :  { %v662_v1 = vld [vmem:[%s972_s0] ss:$28 sps:$4 sm:$0xff]   ;;  %72 = vrot.lane.b32.xlu0 %v660_v0, %s674_s22  ;;  %v663_v2 = vld [vmem:[%s972_s0 + $0x8] ss:$28 sps:$4 sm:$0xff]   ;;  %399 = vmatprep.subr.bf16.mxu0 %v660_v0  ;;  %s678_s30 = smov 108   ;;  %s679_s6 = smov 92  }
   0x3   :  { %70 = vrot.lane.b32.xlu1 %v662_v1, %s674_s22  ;;  %400 = vmatpush1.bf16.msra.mxu0 %v662_v1  ;;  %v749_v4 = vld [vmem:[%s973_s1] sm:$0xff]  ;;  %s680_s9 = smov 91   ;;  %s681_s1 = smov 90   ;;  %v768_v6 = vld [vmem:[%s972_s0 + $0x10] ss:$28 sps:$4 sm:$0xff]   ;;  %vm183_vm4 = vcmask 891904  }
   0x4   :  { %440 = vmatprep.subr.bf16.mxu1 %v726_v3  ;;  %v753_v5 = vcombine.high %v749_v4, %v749_v4  ;;  %v775_v7 = vld [vmem:[%s972_s0 + $0x14] ss:$28 sps:$4 sm:$0xff]   ;;  %vm216_vm5 = vcmask 883712   ;;  %vm249_vm6 = vcmask 752640   ;;  %vm282_vm7 = vcmask 744448  }
   0x5   :  { %441 = vmatpush1.bf16.msra.mxu1 %v663_v2  ;;  %v669_v8 = vld [vmem:[%s972_s0 + $0x18] ss:$28 sps:$4 sm:$0xff]   ;;  %vm315_vm8 = vcmask 736256   ;;  %v876_v49 = vcombine.low %v749_v4, %v749_v4 }
   0x6   :  { %74 = vrot.lane.b32.xlu0 %v663_v2, %s674_s22  ;;  %643 = vmatprep.mubr.msk.bf16.mxu0 %vm395_vm0, %v753_v5 }
   0x7   :  { %105 = vrot.lane.b32.xlu1 %v660_v0, %s675_s27  ;;  %644 = vmatprep.mubr.msk.bf16.mxu1 %vm395_vm0, %v753_v5 }
   0xa   :  { %107 = vrot.lane.b32.xlu0 %v663_v2, %s675_s27 }
   0xb   :  { %103 = vrot.lane.b32.xlu1 %v662_v1, %s675_s27 }
   0xe   :  { %138 = vrot.lane.b32.xlu0 %v660_v0, %s676_s28 }
   0xf   :  { %140 = vrot.lane.b32.xlu1 %v663_v2, %s676_s28 }
  0x12   :  { %136 = vrot.lane.b32.xlu0 %v662_v1, %s676_s28 }
  0x13   :  { %171 = vrot.lane.b32.xlu1 %v660_v0, %s677_s29 }
  0x16   :  { %173 = vrot.lane.b32.xlu0 %v663_v2, %s677_s29 }
  0x17   :  { %169 = vrot.lane.b32.xlu1 %v662_v1, %s677_s29 }
  0x1a   :  { %204 = vrot.lane.b32.xlu0 %v660_v0, %s678_s30 }
  0x1b   :  { %206 = vrot.lane.b32.xlu1 %v663_v2, %s678_s30 }
  0x1e   :  { %202 = vrot.lane.b32.xlu0 %v662_v1, %s678_s30 }
  0x1f   :  { %237 = vrot.lane.b32.xlu1 %v660_v0, %s679_s6 }
  0x22   :  { %239 = vrot.lane.b32.xlu0 %v663_v2, %s679_s6 }
  0x23   :  { %235 = vrot.lane.b32.xlu1 %v662_v1, %s679_s6 }
  0x26   :  { %270 = vrot.lane.b32.xlu0 %v660_v0, %s680_s9 }
  0x27   :  { %272 = vrot.lane.b32.xlu1 %v663_v2, %s680_s9 }
  0x2a   :  { %268 = vrot.lane.b32.xlu0 %v662_v1, %s680_s9 }
  0x2b   :  { %303 = vrot.lane.b32.xlu1 %v660_v0, %s681_s1 }
  0x2e   :  { %305 = vrot.lane.b32.xlu0 %v663_v2, %s681_s1 }
  0x2f   :  { %301 = vrot.lane.b32.xlu1 %v662_v1, %s681_s1 }
  0x32   :  { %76 = vrot.lane.b32.xlu0 %v726_v3, %s674_s22 }
  0x33   :  { %78 = vrot.lane.b32.xlu1 %v768_v6, %s674_s22 }
  0x36   :  { %80 = vrot.lane.b32.xlu0 %v775_v7, %s674_s22 }
  0x37   :  { %82 = vrot.lane.b32.xlu1 %v669_v8, %s674_s22 }
  0x3a   :  { %109 = vrot.lane.b32.xlu0 %v726_v3, %s675_s27 }
  0x3b   :  { %111 = vrot.lane.b32.xlu1 %v768_v6, %s675_s27 }
  0x3e   :  { %113 = vrot.lane.b32.xlu0 %v775_v7, %s675_s27 }
  0x3f   :  { %115 = vrot.lane.b32.xlu1 %v669_v8, %s675_s27 }
  0x42   :  { %142 = vrot.lane.b32.xlu0 %v726_v3, %s676_s28 }
  0x43   :  { %144 = vrot.lane.b32.xlu1 %v768_v6, %s676_s28 }
  0x46   :  { %146 = vrot.lane.b32.xlu0 %v775_v7, %s676_s28 }
  0x47   :  { %148 = vrot.lane.b32.xlu1 %v669_v8, %s676_s28 }
  0x4a   :  { %175 = vrot.lane.b32.xlu0 %v726_v3, %s677_s29 }
  0x4b   :  { %177 = vrot.lane.b32.xlu1 %v768_v6, %s677_s29 }
  0x4e   :  { %179 = vrot.lane.b32.xlu0 %v775_v7, %s677_s29 }
  0x4f   :  { %181 = vrot.lane.b32.xlu1 %v669_v8, %s677_s29 }
  0x52   :  { %208 = vrot.lane.b32.xlu0 %v726_v3, %s678_s30 }
  0x53   :  { %210 = vrot.lane.b32.xlu1 %v768_v6, %s678_s30 }
  0x56   :  { %212 = vrot.lane.b32.xlu0 %v775_v7, %s678_s30 }
  0x57   :  { %214 = vrot.lane.b32.xlu1 %v669_v8, %s678_s30 }
  0x5a   :  { %241 = vrot.lane.b32.xlu0 %v726_v3, %s679_s6 }
  0x5b   :  { %243 = vrot.lane.b32.xlu1 %v768_v6, %s679_s6 }
  0x5e   :  { %245 = vrot.lane.b32.xlu0 %v775_v7, %s679_s6 }
  0x5f   :  { %247 = vrot.lane.b32.xlu1 %v669_v8, %s679_s6 }
  0x62   :  { %274 = vrot.lane.b32.xlu0 %v726_v3, %s680_s9 }
  0x63   :  { %276 = vrot.lane.b32.xlu1 %v768_v6, %s680_s9 }
  0x66   :  { %278 = vrot.lane.b32.xlu0 %v775_v7, %s680_s9 }
  0x67   :  { %280 = vrot.lane.b32.xlu1 %v669_v8, %s680_s9 }
  0x6a   :  { %307 = vrot.lane.b32.xlu0 %v726_v3, %s681_s1 }
  0x6b   :  { %309 = vrot.lane.b32.xlu1 %v768_v6, %s681_s1 }
  0x6e   :  { %311 = vrot.lane.b32.xlu0 %v775_v7, %s681_s1 }
  0x6f   :  { %313 = vrot.lane.b32.xlu1 %v669_v8, %s681_s1 }
  0x74   :  { %v73_v9 = vpop.permute.xlu0 %72 }
  0x75   :  { %v71_v10 = vpop.permute.xlu1 %70 }
  0x76   :  { %v85_v14 = vsel %vm84_vm1, %v71_v10, %v73_v9 }
  0x78   :  { %v834_v11 = vpop.permute.xlu0 %74 }
  0x79   :  { %v106_v12 = vpop.permute.xlu1 %105  ;;  %v86_v13 = vsel %vm84_vm1, %v73_v9, %v834_v11 }
  0x7a   :  { %401 = vmatprep.subr.bf16.mxu0 %v86_v13 }
  0x7b   :  { %402 = vmatpush1.bf16.msra.mxu0 %v85_v14 }
  0x7c   :  { %v839_v15 = vpop.permute.xlu0 %107 }
  0x7d   :  { %v104_v16 = vpop.permute.xlu1 %103  ;;  %v119_v17 = vsel %vm117_vm2, %v106_v12, %v839_v15 }
  0x7e   :  { %403 = vmatprep.subr.bf16.mxu0 %v119_v17  ;;  %v118_v18 = vsel %vm117_vm2, %v104_v16, %v106_v12 }
  0x7f   :  { %404 = vmatpush1.bf16.msra.mxu0 %v118_v18 }
  0x80   :  { %v139_v19 = vpop.permute.xlu0 %138 }
  0x81   :  { %v844_v20 = vpop.permute.xlu1 %140 }
  0x82   :  { %v152_v21 = vsel %vm150_vm3, %v139_v19, %v844_v20 }
  0x83   :  { %405 = vmatprep.subr.bf16.mxu0 %v152_v21 }
  0x84   :  { %v137_v22 = vpop.permute.xlu0 %136 }
  0x85   :  { %v172_v23 = vpop.permute.xlu1 %171  ;;  %v151_v24 = vsel %vm150_vm3, %v137_v22, %v139_v19 }
  0x86   :  { %406 = vmatpush1.bf16.msra.mxu0 %v151_v24 }
  0x88   :  { %v849_v25 = vpop.permute.xlu0 %173 }
  0x89   :  { %v170_v26 = vpop.permute.xlu1 %169  ;;  %v185_v27 = vsel %vm183_vm4, %v172_v23, %v849_v25 }
  0x8a   :  { %407 = vmatprep.subr.bf16.mxu0 %v185_v27  ;;  %v184_v28 = vsel %vm183_vm4, %v170_v26, %v172_v23 }
  0x8b   :  { %408 = vmatpush1.bf16.msra.mxu0 %v184_v28 }
  0x8c   :  { %v205_v29 = vpop.permute.xlu0 %204 }
  0x8d   :  { %v854_v30 = vpop.permute.xlu1 %206 }
  0x8e   :  { %v218_v31 = vsel %vm216_vm5, %v205_v29, %v854_v30 }
  0x8f   :  { %409 = vmatprep.subr.bf16.mxu0 %v218_v31 }
  0x90   :  { %v203_v32 = vpop.permute.xlu0 %202 }
  0x91   :  { %v238_v33 = vpop.permute.xlu1 %237  ;;  %v217_v34 = vsel %vm216_vm5, %v203_v32, %v205_v29 }
  0x92   :  { %410 = vmatpush1.bf16.msra.mxu0 %v217_v34 }
  0x94   :  { %v859_v35 = vpop.permute.xlu0 %239 }
  0x95   :  { %v236_v36 = vpop.permute.xlu1 %235  ;;  %v251_v37 = vsel %vm249_vm6, %v238_v33, %v859_v35 }
  0x96   :  { %411 = vmatprep.subr.bf16.mxu0 %v251_v37  ;;  %v250_v38 = vsel %vm249_vm6, %v236_v36, %v238_v33 }
  0x97   :  { %412 = vmatpush1.bf16.msra.mxu0 %v250_v38 }
  0x98   :  { %v271_v39 = vpop.permute.xlu0 %270 }
  0x99   :  { %v864_v40 = vpop.permute.xlu1 %272 }
  0x9a   :  { %v284_v41 = vsel %vm282_vm7, %v271_v39, %v864_v40 }
  0x9b   :  { %413 = vmatprep.subr.bf16.mxu0 %v284_v41 }
  0x9c   :  { %v269_v42 = vpop.permute.xlu0 %268 }
  0x9d   :  { %v304_v43 = vpop.permute.xlu1 %303  ;;  %v283_v44 = vsel %vm282_vm7, %v269_v42, %v271_v39 }
  0x9e   :  { %414 = vmatpush1.bf16.msra.mxu0 %v283_v44 }
  0xa0   :  { %v869_v45 = vpop.permute.xlu0 %305 }
  0xa1   :  { %v302_v46 = vpop.permute.xlu1 %301  ;;  %v317_v47 = vsel %vm315_vm8, %v304_v43, %v869_v45 }
  0xa2   :  { %415 = vmatprep.subr.bf16.mxu0 %v317_v47  ;;  %v316_v48 = vsel %vm315_vm8, %v302_v46, %v304_v43 }
  0xa3   :  { %416 = vmatpush1.bf16.msra.mxu0 %v316_v48 }
  0xa4   :  { %v77_v50 = vpop.permute.xlu0 %76  ;;  %481 = vmatprep.subr.bf16.mxu0 %v775_v7 }
  0xa5   :  { %v79_v51 = vpop.permute.xlu1 %78  ;;  %v87_v52 = vsel %vm84_vm1, %v834_v11, %v77_v50 }
  0xa6   :  { %v88_v53 = vsel %vm84_vm1, %v77_v50, %v79_v51  ;;  %432 = vmatmul.mubr.bf16.vlgmr.msra.gmra.mrb[0].mxu0 %v876_v49 }
  0xa7   :  { %442 = vmatprep.subr.bf16.mxu1 %v88_v53  ;;  %482 = vmatpush1.bf16.msra.mxu0 %v768_v6 }
  0xa8   :  { %443 = vmatpush1.bf16.msra.mxu1 %v87_v52  ;;  %v81_v54 = vpop.permute.xlu0 %80  ;;  %645 = vmatprep.mubr.msk.bf16.mxu0 %vm395_vm0, %v753_v5  ;;  %v524_v52 = vlaneseq }
  0xa9   :  { %v89_v55 = vsel %vm84_vm1, %v79_v51, %v81_v54  ;;  %v83_v56 = vpop.permute.xlu1 %82 }
  0xaa   :  { %v90_v57 = vsel %vm84_vm1, %v81_v54, %v83_v56  ;;  %v525_v53 = vshrl.u32 %v524_v52, 7 }
  0xab   :  { %483 = vmatprep.subr.bf16.mxu0 %v90_v57 }
  0xac   :  { %484 = vmatpush1.bf16.msra.mxu0 %v89_v55  ;;  %v110_v58 = vpop.permute.xlu0 %109  ;;  %v526_v54 = vsub.s32 0, %v525_v53  ;;  %v530_v55 = vsub.s32 1, %v525_v53 }
  0xad   :  { %v112_v59 = vpop.permute.xlu1 %111  ;;  %v120_v60 = vsel %vm117_vm2, %v839_v15, %v110_v58 }
  0xae   :  { %v121_v61 = vsel %vm117_vm2, %v110_v58, %v112_v59 }
  0xaf   :  { %444 = vmatprep.subr.bf16.mxu1 %v121_v61 }
  0xb0   :  { %445 = vmatpush1.bf16.msra.mxu1 %v120_v60  ;;  %v114_v62 = vpop.permute.xlu0 %113 }
  0xb1   :  { %v122_v63 = vsel %vm117_vm2, %v112_v59, %v114_v62  ;;  %v116_v0 = vpop.permute.xlu1 %115 }
  0xb2   :  { %v123_v1 = vsel %vm117_vm2, %v114_v62, %v116_v0  ;;  %v534_v0 = vsub.s32 2, %v525_v53 }
  0xb3   :  { %485 = vmatprep.subr.bf16.mxu0 %v123_v1  ;;  %v538_v1 = vsub.s32 3, %v525_v53 }
  0xb4   :  { %486 = vmatpush1.bf16.msra.mxu0 %v122_v63  ;;  %v143_v2 = vpop.permute.xlu0 %142 }
  0xb5   :  { %v145_v3 = vpop.permute.xlu1 %144  ;;  %v153_v4 = vsel %vm150_vm3, %v844_v20, %v143_v2 }
  0xb6   :  { %v154_v5 = vsel %vm150_vm3, %v143_v2, %v145_v3 }
  0xb7   :  { %446 = vmatprep.subr.bf16.mxu1 %v154_v5  ;;  %v546_v5 = vsub.s32 5, %v525_v53 }
  0xb8   :  { %447 = vmatpush1.bf16.msra.mxu1 %v153_v4  ;;  %v147_v6 = vpop.permute.xlu0 %146 }
  0xb9   :  { %v155_v7 = vsel %vm150_vm3, %v145_v3, %v147_v6  ;;  %v149_v8 = vpop.permute.xlu1 %148  ;;  %v542_v3 = vsub.s32 4, %v525_v53 }
  0xba   :  { %v156_v9 = vsel %vm150_vm3, %v147_v6, %v149_v8 }
  0xbb   :  { %487 = vmatprep.subr.bf16.mxu0 %v156_v9 }
  0xbc   :  { %488 = vmatpush1.bf16.msra.mxu0 %v155_v7  ;;  %v176_v10 = vpop.permute.xlu0 %175 }
  0xbd   :  { %v178_v11 = vpop.permute.xlu1 %177  ;;  %v186_v12 = vsel %vm183_vm4, %v849_v25, %v176_v10 }
  0xbe   :  { %v187_v13 = vsel %vm183_vm4, %v176_v10, %v178_v11 }
  0xbf   :  { %448 = vmatprep.subr.bf16.mxu1 %v187_v13 }
  0xc0   :  { %449 = vmatpush1.bf16.msra.mxu1 %v186_v12  ;;  %v180_v14 = vpop.permute.xlu0 %179 }
  0xc1   :  { %v188_v15 = vsel %vm183_vm4, %v178_v11, %v180_v14  ;;  %v182_v16 = vpop.permute.xlu1 %181 }
  0xc2   :  { %v189_v17 = vsel %vm183_vm4, %v180_v14, %v182_v16 }
  0xc3   :  { %489 = vmatprep.subr.bf16.mxu0 %v189_v17 }
  0xc4   :  { %490 = vmatpush1.bf16.msra.mxu0 %v188_v15  ;;  %v209_v18 = vpop.permute.xlu0 %208 }
  0xc5   :  { %v211_v19 = vpop.permute.xlu1 %210  ;;  %v219_v20 = vsel %vm216_vm5, %v854_v30, %v209_v18 }
  0xc6   :  { %v220_v21 = vsel %vm216_vm5, %v209_v18, %v211_v19 }
  0xc7   :  { %450 = vmatprep.subr.bf16.mxu1 %v220_v21 }
  0xc8   :  { %451 = vmatpush1.bf16.msra.mxu1 %v219_v20  ;;  %v213_v22 = vpop.permute.xlu0 %212 }
  0xc9   :  { %v221_v23 = vsel %vm216_vm5, %v211_v19, %v213_v22  ;;  %v215_v24 = vpop.permute.xlu1 %214 }
  0xca   :  { %v222_v25 = vsel %vm216_vm5, %v213_v22, %v215_v24 }
  0xcb   :  { %491 = vmatprep.subr.bf16.mxu0 %v222_v25 }
  0xcc   :  { %492 = vmatpush1.bf16.msra.mxu0 %v221_v23  ;;  %v242_v26 = vpop.permute.xlu0 %241 }
  0xcd   :  { %v244_v27 = vpop.permute.xlu1 %243  ;;  %v252_v28 = vsel %vm249_vm6, %v859_v35, %v242_v26 }
  0xce   :  { %v253_v29 = vsel %vm249_vm6, %v242_v26, %v244_v27 }
  0xcf   :  { %452 = vmatprep.subr.bf16.mxu1 %v253_v29 }
  0xd0   :  { %453 = vmatpush1.bf16.msra.mxu1 %v252_v28  ;;  %v246_v30 = vpop.permute.xlu0 %245 }
  0xd1   :  { %v254_v31 = vsel %vm249_vm6, %v244_v27, %v246_v30  ;;  %v248_v32 = vpop.permute.xlu1 %247 }
  0xd2   :  { %v255_v33 = vsel %vm249_vm6, %v246_v30, %v248_v32 }
  0xd3   :  { %493 = vmatprep.subr.bf16.mxu0 %v255_v33 }
  0xd4   :  { %494 = vmatpush1.bf16.msra.mxu0 %v254_v31  ;;  %v275_v34 = vpop.permute.xlu0 %274 }
  0xd5   :  { %v277_v36 = vpop.permute.xlu1 %276  ;;  %v285_v37 = vsel %vm282_vm7, %v864_v40, %v275_v34 }
  0xd6   :  { %v286_v38 = vsel %vm282_vm7, %v275_v34, %v277_v36 }
  0xd7   :  { %454 = vmatprep.subr.bf16.mxu1 %v286_v38 }
  0xd8   :  { %455 = vmatpush1.bf16.msra.mxu1 %v285_v37  ;;  %v279_v35 = vpop.permute.xlu0 %278 }
  0xd9   :  { %v287_v39 = vsel %vm282_vm7, %v277_v36, %v279_v35  ;;  %v281_v41 = vpop.permute.xlu1 %280 }
  0xda   :  { %v288_v42 = vsel %vm282_vm7, %v279_v35, %v281_v41 }
  0xdb   :  { %495 = vmatprep.subr.bf16.mxu0 %v288_v42 }
  0xdc   :  { %496 = vmatpush1.bf16.msra.mxu0 %v287_v39  ;;  %v308_v43 = vpop.permute.xlu0 %307 }
  0xdd   :  { %v310_v44 = vpop.permute.xlu1 %309  ;;  %v318_v46 = vsel %vm315_vm8, %v869_v45, %v308_v43  ;;  %v522_v45 = vld [vmem:[%s974_s2] sm:$0x3f] }
  0xde   :  { %v319_v47 = vsel %vm315_vm8, %v308_v43, %v310_v44  ;;  %v527_v56 = vrot.slane %v522_v45, %v526_v54  ;;  %v531_v57 = vrot.slane %v522_v45, %v530_v55  ;;  %v535_v2 = vrot.slane %v522_v45, %v534_v0 }
  0xdf   :  { %456 = vmatprep.subr.bf16.mxu1 %v319_v47  ;;  %v539_v4 = vrot.slane %v522_v45, %v538_v1  ;;  %v543_v9 = vrot.slane %v522_v45, %v542_v3  ;;  %v547_v12 = vrot.slane %v522_v45, %v546_v5  ;;  %v596_v45 = vld [vmem:[%s975_s3] sm:$0xff] }
  0xe0   :  { %457 = vmatpush1.bf16.msra.mxu1 %v318_v46  ;;  %v312_v40 = vpop.permute.xlu0 %311 }
  0xe1   :  { %v320_v48 = vsel %vm315_vm8, %v310_v44, %v312_v40  ;;  %v314_v50 = vpop.permute.xlu1 %313 }
  0xe2   :  { %v321_v51 = vsel %vm315_vm8, %v312_v40, %v314_v50 }
  0xe3   :  { %473 = vmatmul.mubr.bf16.vlgmr.msra.gmra.mrb[0].mxu1 %v876_v49  ;;  %497 = vmatprep.subr.bf16.mxu0 %v321_v51  ;;  %v682_v51 = vmov 0  }
  0xe4   :  { %498 = vmatpush1.bf16.msra.mxu0 %v320_v48  ;;  %658 = vset.pattern.permute.xlu0 %v682_v51 }
  0xe5   :  { %659 = vset.pattern.permute.xlu1 %v682_v51 }
  0xe7   :  { %514 = vmatmul.mubr.bf16.vlgmr.msra.gmra.mrb[4].mxu0 %v876_v49 }
 0x179   :  { %v928_v58 = vpop.f32.mrb[0].mxu0 }
 0x17a   :  { %v554_v59 = vmul.f32 %v527_v56, %v928_v58  ;;  %v931_v60 = vpop.f32.mrb[1].mxu0 }
 0x17b   :  { %v555_v61 = vmul.f32 %v531_v57, %v931_v60  ;;  %v437_v62 = vpop.f32.mrb[2].mxu0 }
 0x17c   :  { %v438_v49 = vpop.f32.mrb[3].mxu0 }
 0x17d   :  { %v560_v63 = vadd.f32 %v555_v61, %v554_v59 }
 0x1b6   :  { %v934_v6 = vpop.f32.mrb[0].mxu1 }
 0x1b7   :  { %v556_v7 = vmul.f32 %v535_v2, %v934_v6  ;;  %v937_v8 = vpop.f32.mrb[1].mxu1 }
 0x1b8   :  { %v557_v10 = vmul.f32 %v539_v4, %v937_v8  ;;  %v478_v11 = vpop.f32.mrb[2].mxu1 }
 0x1b9   :  { %v561_v13 = vadd.f32 %v560_v63, %v556_v7  ;;  %v479_v14 = vpop.f32.mrb[3].mxu1 }
 0x1ba   :  { %v515_v15 = vpop.f32.mrb[4].mxu0 }
 0x1bb   :  { %v558_v16 = vmul.f32 %v543_v9, %v515_v15  ;;  %v517_v17 = vpop.f32.mrb[5].mxu0  ;;  %v562_v18 = vadd.f32 %v561_v13, %v557_v10 }
 0x1bc   :  { %v519_v19 = vpop.f32.mrb[6].mxu0  ;;  %v559_v20 = vmul.f32 %v547_v12, %v517_v17 }
 0x1bd   :  { %v520_v21 = vpop.f32.mrb[7].mxu0  ;;  %v563_v22 = vadd.f32 %v562_v18, %v558_v16 }
 0x1bf   :  { %v564_v23 = vadd.f32 %v563_v22, %v559_v20 }
 0x1c1   :  { %565 = vadd.xlane.f32.xlu0 %v564_v23 }
 0x24e   :  { %v566_v24 = vpop.xlane.xlu0 %565 }
 0x24f   :  { %v567_v25 = vmul.f32 0.001953125, %v566_v24 }
 0x251   :  { %v568_v26 = vsub.f32 %v928_v58, %v567_v25  ;;  %v569_v27 = vsub.f32 %v931_v60, %v567_v25  ;;  %v570_v28 = vsub.f32 %v934_v6, %v567_v25  ;;  %v571_v29 = vsub.f32 %v937_v8, %v567_v25 }
 0x252   :  { %v572_v30 = vsub.f32 %v515_v15, %v567_v25  ;;  %v573_v34 = vsub.f32 %v517_v17, %v567_v25 }
 0x253   :  { %v574_v31 = vmul.f32 %v568_v26, %v527_v56  ;;  %v575_v32 = vmul.f32 %v569_v27, %v531_v57  ;;  %v576_v33 = vmul.f32 %v570_v28, %v535_v2  ;;  %v577_v36 = vmul.f32 %v571_v29, %v539_v4  ;;  %v598_v57 = vld [vmem:[%s976_s4] sm:$0xff] }
 0x254   :  { %v578_v35 = vmul.f32 %v572_v30, %v543_v9  ;;  %v579_v42 = vmul.f32 %v573_v34, %v547_v12 }
 0x255   :  { %v580_v37 = vmul.f32 %v574_v31, %v574_v31  ;;  %v581_v38 = vmul.f32 %v575_v32, %v575_v32  ;;  %v582_v39 = vmul.f32 %v576_v33, %v576_v33  ;;  %v583_v43 = vmul.f32 %v577_v36, %v577_v36 }
 0x256   :  { %v584_v46 = vmul.f32 %v578_v35, %v578_v35  ;;  %v585_v40 = vmul.f32 %v579_v42, %v579_v42 }
 0x257   :  { %v586_v41 = vadd.f32 %v581_v38, %v580_v37 }
 0x259   :  { %v587_v44 = vadd.f32 %v586_v41, %v582_v39 }
 0x25b   :  { %v588_v47 = vadd.f32 %v587_v44, %v583_v43 }
 0x25d   :  { %v589_v48 = vadd.f32 %v588_v47, %v584_v46 }
 0x25f   :  { %v590_v50 = vadd.f32 %v589_v48, %v585_v40 }
 0x261   :  { %591 = vadd.xlane.f32.xlu1 %v590_v50 }
 0x2ee   :  { %v592_v52 = vpop.xlane.xlu1 %591 }
 0x2ef   :  { %v593_v53 = vmul.f32 0.001953125, %v592_v52 }
 0x2f1   :  { %v594_v54 = vadd.f32 1e-05, %v593_v53 }
 0x2f3   :  { %672 = vrsqrt.f32 %v594_v54 }
 0x2fd   :  { %v673_v55 = vpop.eup %672 }
 0x2fe   :  { %v597_v56 = vmul.f32 %v673_v55, %v596_v45 }
 0x300   :  { %603 = vperm.xlu0 %658, %v597_v56   ;;  %v599_v59 = vmul.f32 %v597_v56, %v567_v25 }
 0x302   :  { %v600_v61 = vsub.f32 %v598_v57, %v599_v59 }
 0x304   :  { %614 = vperm.xlu1 %659, %v600_v61  }
 0x37f   :  { %v604_v62 = vpop.permute.xlu0 %603 }
 0x380   :  { %v606_v49 = vmul.f32 %v604_v62, %v928_v58  ;;  %v607_v63 = vmul.f32 %v604_v62, %v931_v60  ;;  %v608_v0 = vmul.f32 %v604_v62, %v934_v6  ;;  %v609_v1 = vmul.f32 %v604_v62, %v937_v8 }
 0x381   :  { %v610_v2 = vmul.f32 %v604_v62, %v515_v15  ;;  %v611_v3 = vmul.f32 %v604_v62, %v517_v17 }
 0x383   :  { %v615_v4 = vpop.permute.xlu1 %614 }
 0x384   :  { %v617_v5 = vadd.f32 %v615_v4, %v606_v49  ;;  %v618_v7 = vadd.f32 %v615_v4, %v607_v63  ;;  %v619_v9 = vadd.f32 %v615_v4, %v608_v0  ;;  %v620_v10 = vadd.f32 %v615_v4, %v609_v1 }
 0x385   :  { %v621_v11 = vadd.f32 %v615_v4, %v610_v2  ;;  %v622_v12 = vadd.f32 %v615_v4, %v611_v3 }
 0x386   :  { %623 = vst [vmem:[%s977_s5] sm:$0xff] %v617_v5  ;;  %624 = vst [vmem:[%s977_s5 + $0x8] sm:$0xff] %v618_v7 }
 0x387   :  { %625 = vst [vmem:[%s977_s5 + $0x10] sm:$0xff] %v619_v9  ;;  %646 = vst [vmem:[%s977_s5 + $0x18] sm:$0xff] %v620_v10 }
 0x388   :  { %647 = vst [vmem:[%s977_s5 + $0x20] sm:$0xff] %v621_v11  ;;  %648 = vst [vmem:[%s977_s5 + $0x28] sm:$0xff] %v622_v12 }

</bundles_post_ra>
